<compile_context>
chip_gen: v6e
topology: v6e:2x2x1
jax: 0.10.0
libtpu: 0.0.40
codegen_flags: <defaults>
</compile_context>

<pallas_src>
import jax
import jax.numpy as jnp
from jax.experimental import pallas as pl
from jax.experimental.pallas import tpu as pltpu


def _linear_kernel(x_ref, w_ref, b_ref, o_ref):
    # x_ref: (3, TR, TC) f32 block in VMEM (batch dense on sublane+lane axes)
    # w_ref: (3,) f32 in SMEM, b_ref: (1,) f32 in SMEM
    # o_ref: (TR, TC) f32 block in VMEM (dense output slab)
    w0 = w_ref[0]
    w1 = w_ref[1]
    w2 = w_ref[2]
    b = b_ref[0]
    y = w0 * x_ref[0] + w1 * x_ref[1] + w2 * x_ref[2] + b
    o_ref[...] = y.astype(o_ref.dtype)


def linear_forward(x, w, b, *, lanes=1024, block_rows=256):
    """x: [B, 3] f32, w: [3] f32, b: [1] f32 -> [B, 1] f32."""
    B, fin = x.shape
    assert fin == 3

    # --- 2-D batch layout: batch -> [R, C], C on lanes, R on sublanes. ---
    C = lanes
    R = pl.cdiv(B, C)
    Bp = R * C

    xt = x.T                                           # [3, B] feature-major
    if Bp != B:
        # Minimal pad (< C elems/feature) so the reshape below is a free view.
        xt = jnp.pad(xt, ((0, 0), (0, Bp - B)))
    x3 = xt.reshape(fin, R, C)                         # dense batch planes

    # Rows per grid step: multiple of 8 (sublane quantum) or the full R.
    tr = min(block_rows, R)
    if tr != R:
        tr = max(8, (tr // 8) * 8)
    n_blocks = pl.cdiv(R, tr)                          # ragged tail is masked

    out = pl.pallas_call(
        _linear_kernel,
        out_shape=jax.ShapeDtypeStruct((R, C), x.dtype),
        grid=(n_blocks,),
        in_specs=[
            # Stream x in dense (3, tr, C) tiles over the row-block grid.
            pl.BlockSpec((fin, tr, C), lambda i: (0, i, 0)),
            # Tiny weight/bias arrays resident in SMEM, read as scalars.
            pl.BlockSpec(memory_space=pltpu.MemorySpace.SMEM),
            pl.BlockSpec(memory_space=pltpu.MemorySpace.SMEM),
        ],
        out_specs=pl.BlockSpec((tr, C), lambda i: (i, 0)),
        compiler_params=pltpu.CompilerParams(
            dimension_semantics=("parallel",),
            # ~8 MiB double-buffered footprint; raise scoped limit so the same
            # tiling works on v5e (16 MiB default) without shrinking blocks.
            vmem_limit_bytes=32 << 20,
        ),
    )(x3, w, b)

    # Drop padding and restore the PyTorch [B, 1] output layout.
    return out.reshape(Bp)[:B].reshape(B, 1)


class MultivariateLinearRegressionModel:
    """JAX/Pallas port of the PyTorch module: self.linear = nn.Linear(3, 1)."""

    def __init__(self, key):
        # Deterministic init mimicking nn.Linear default:
        # U(-1/sqrt(fan_in), 1/sqrt(fan_in)) for weight and bias.
        kw, kb = jax.random.split(key)
        fan_in = 3
        bound = 1.0 / jnp.sqrt(fan_in)
        self.weight = jax.random.uniform(
            kw, (fan_in,), dtype=jnp.float32, minval=-bound, maxval=bound)
        self.bias = jax.random.uniform(
            kb, (1,), dtype=jnp.float32, minval=-bound, maxval=bound)

    def __call__(self, x, **kw):
        return linear_forward(x, self.weight, self.bias, **kw)


if __name__ == "__main__":
    key = jax.random.PRNGKey(0)
    k_model, k_x1, k_x2 = jax.random.split(key, 3)

    model = MultivariateLinearRegressionModel(k_model)

    # 1) Small batch (single block, R == 1 path).
    batch = 8
    x = jax.random.normal(k_x1, (batch, 3), dtype=jnp.float32)
    y = model(x)
    jax.block_until_ready(y)
    y_ref = x @ model.weight.reshape(3, 1) + model.bias
    assert y.shape == (batch, 1)
    assert jnp.allclose(y, y_ref, atol=1e-5), "mismatch vs reference (small)"

    # 2) Larger ragged batch exercising multi-block grid + masked tail block.
    batch2 = 2600
    x2 = jax.random.normal(k_x2, (batch2, 3), dtype=jnp.float32)
    y2 = model(x2, lanes=256, block_rows=8)
    jax.block_until_ready(y2)
    y2_ref = x2 @ model.weight.reshape(3, 1) + model.bias
    assert y2.shape == (batch2, 1)
    assert jnp.allclose(y2, y2_ref, atol=1e-5), "mismatch vs reference (ragged)"

    print("KERNEL_OK")
</pallas_src>

<mosaic_0001>
module attributes {stable_mosaic.version = 11 : i64} {
  func.func @_linear_kernel(%arg0: i32, %arg1: memref<3x1x1024xf32, #tpu.memory_space<vmem>>, %arg2: memref<3xf32, #tpu.memory_space<smem>>, %arg3: memref<1xf32, #tpu.memory_space<smem>>, %arg4: memref<1x1024xf32, #tpu.memory_space<vmem>>) attributes {dimension_semantics = [#tpu.dimension_semantics<parallel>], iteration_bounds = array<i64: 1>, scalar_prefetch = 0 : i64, scratch_operands = 0 : i64, tpu.core_type = #tpu.core_type<tc>, window_params = [{transform_indices = @transform_0, window_bounds = array<i64: 3, 1, 1024>}, {transform_indices = @transform_1, window_bounds = array<i64: 3>}, {transform_indices = @transform_2, window_bounds = array<i64: 1>}, {transform_indices = @transform_3, window_bounds = array<i64: 1, 1024>}]} {
    %c0 = arith.constant 0 : index
    %0 = memref.load %arg2[%c0] : memref<3xf32, #tpu.memory_space<smem>>
    %c1 = arith.constant 1 : index
    %1 = memref.load %arg2[%c1] : memref<3xf32, #tpu.memory_space<smem>>
    %c2 = arith.constant 2 : index
    %2 = memref.load %arg2[%c2] : memref<3xf32, #tpu.memory_space<smem>>
    %c0_0 = arith.constant 0 : index
    %3 = memref.load %arg3[%c0_0] : memref<1xf32, #tpu.memory_space<smem>>
    %c0_1 = arith.constant 0 : index
    %c0_2 = arith.constant 0 : index
    %c0_3 = arith.constant 0 : index
    %4 = vector.load %arg1[%c0_1, %c0_2, %c0_3] : memref<3x1x1024xf32, #tpu.memory_space<vmem>>, vector<1x1x1024xf32>
    %5 = vector.shape_cast %4 : vector<1x1x1024xf32> to vector<1x1024xf32>
    %6 = vector.broadcast %0 : f32 to vector<1x1024xf32>
    %7 = arith.mulf %6, %5 : vector<1x1024xf32>
    %c1_4 = arith.constant 1 : index
    %c0_5 = arith.constant 0 : index
    %c0_6 = arith.constant 0 : index
    %8 = vector.load %arg1[%c1_4, %c0_5, %c0_6] : memref<3x1x1024xf32, #tpu.memory_space<vmem>>, vector<1x1x1024xf32>
    %9 = vector.shape_cast %8 : vector<1x1x1024xf32> to vector<1x1024xf32>
    %10 = vector.broadcast %1 : f32 to vector<1x1024xf32>
    %11 = arith.mulf %10, %9 : vector<1x1024xf32>
    %12 = arith.addf %7, %11 : vector<1x1024xf32>
    %c2_7 = arith.constant 2 : index
    %c0_8 = arith.constant 0 : index
    %c0_9 = arith.constant 0 : index
    %13 = vector.load %arg1[%c2_7, %c0_8, %c0_9] : memref<3x1x1024xf32, #tpu.memory_space<vmem>>, vector<1x1x1024xf32>
    %14 = vector.shape_cast %13 : vector<1x1x1024xf32> to vector<1x1024xf32>
    %15 = vector.broadcast %2 : f32 to vector<1x1024xf32>
    %16 = arith.mulf %15, %14 : vector<1x1024xf32>
    %17 = arith.addf %12, %16 : vector<1x1024xf32>
    %18 = vector.broadcast %3 : f32 to vector<1x1024xf32>
    %19 = arith.addf %17, %18 : vector<1x1024xf32>
    %c0_10 = arith.constant 0 : index
    %c0_11 = arith.constant 0 : index
    %20 = vector.load %arg4[%c0_10, %c0_11] : memref<1x1024xf32, #tpu.memory_space<vmem>>, vector<1x1024xf32>
    tpu.vector_store %arg4[%c0_10, %c0_11], %19 {strides = array<i32>} : memref<1x1024xf32, #tpu.memory_space<vmem>>, vector<1x1024xf32>,
    return
  }
  func.func @transform_0(%arg0: i32) -> (i32, i32, i32) {
    %c0_i32 = arith.constant 0 : i32
    %c0_i32_0 = arith.constant 0 : i32
    %c0_i32_1 = arith.constant 0 : i32
    return %c0_i32, %arg0, %c0_i32_0 : i32, i32, i32
  }
  func.func @transform_1(%arg0: i32) -> i32 {
    %c0_i32 = arith.constant 0 : i32
    %c0_i32_0 = arith.constant 0 : i32
    return %c0_i32 : i32
  }
  func.func @transform_2(%arg0: i32) -> i32 {
    %c0_i32 = arith.constant 0 : i32
    %c0_i32_0 = arith.constant 0 : i32
    return %c0_i32 : i32
  }
  func.func @transform_3(%arg0: i32) -> (i32, i32) {
    %c0_i32 = arith.constant 0 : i32
    %c0_i32_0 = arith.constant 0 : i32
    return %arg0, %c0_i32 : i32, i32
  }
}

</mosaic_0001>

<bundles_post_ra>
// kernel: tpu_custom_call.1
= control target key start
LH: loop header
LB: loop body
LE: loop exit
PB: predicated region body
PF: predicated region fallthrough
CT: control target
= control target key end

     0   :  { %9 = vsyncpa [#allocation4], 0  ;;  %s181_s0 = inlined_call_operand.hbm [shape: f32[3,1,1024], index: 0, kind: input, shape index: {}]   ;;  %s182_s1 = inlined_call_operand.vmem [shape: f32[3], index: 1, kind: input, shape index: {}]   ;;  %s183_s2 = inlined_call_operand.<no memory space> [shape: f32[1], index: 2, kind: input, shape index: {}]   ;;  %s184_s3 = inlined_call_operand.hbm [shape: f32[1,1024], index: 3, kind: output, shape index: {}]  }
   0x1   :  { %10 = vsyncpa [#allocation6], 0 }
   0x2   :  { %11 = vsyncpa [#allocation5], 0  ;;  %s144_s12 = smov [#allocation3]   ;;  %s30_s16 = sshll.u32 %s182_s1, 4  ;;  %s31_s16 = int_to_ptr.vmem [resolvable:$true] %s30_s16 }
   0x3   :  { %s17_s13 = sshll.u32 %s144_s12, 4  ;;  %s18_s13 = int_to_ptr.vmem [resolvable:$true] %s17_s13 }
   0x4   :  { %s94_s17 = scalar_lea.vmem %s18_s13, 384  ;;  %p99_p1 = scmp.lt.s32.totalorder %s18_s13, %s18_s13 }
   0x5   :  { %p95_p0 = scmp.ne.s32.totalorder %s18_s13, %s94_s17  ;;  %p100_p2 = scmp.lt.s32.totalorder %s94_s17, %s94_s17 }
   0x7   :  { %p101_p3 = por %p100_p2, %p99_p1 }
   0x9   :  { %p102_p4 = pnand %p101_p3, %p95_p0 }
   0xb   :  { %105 = shalt.err (!%p102_p4)
}
   0xc   :  { %s145_s18 = smov 128   ;;  %s146_s19 = smov 8  }
   0xd   :  { %23 = dma.hbm_to_vmem [thread:$0]  %s181_s0, 384, %s18_s13, [#allocation4], %s145_s18, %s145_s18, %s146_s19  }
   0xe   :  { %s106_s22 = scalar_lea.vmem %s31_s16, 16  ;;  %p111_p6 = scmp.lt.s32.totalorder %s31_s16, %s31_s16 }
   0xf   :  { %p107_p5 = scmp.ne.s32.totalorder %s31_s16, %s106_s22  ;;  %p112_p7 = scmp.lt.s32.totalorder %s106_s22, %s106_s22 }
  0x11   :  { %p113_p8 = por %p112_p7, %p111_p6 }
  0x13   :  { %p114_p9 = pnand %p113_p8, %p107_p5 }
  0x15   :  { %117 = shalt.err (!%p114_p9)
}
  0x16   :  { %s147_s1 = smov [#allocation7]  }
  0x17   :  { %33 = dma.vmem_to_smem %s31_s16, 16, %s147_s1, [#allocation6]  }
  0x18   :  { %138 = dma.done.wait [#allocation4], 384  }
  0x19   :  { %139 = vsyncadd [#allocation4], 4294966912 }
  0x1a   :  { %140 = dma.done.wait [#allocation6], 16  }
  0x1b   :  { %141 = vsyncadd [#allocation6], 4294967280 }
  0x1c   :  { %42 = sfence }
  0x1d   :  { %s43_s23 = sld [smem:[#allocation7]]  ;;  %v47_v0 = vld [vmem:[#allocation3] sm:$0xff]  ;;  %v51_v1 = vld [vmem:[#allocation3 + $0x8] sm:$0xff]  ;;  %v56_v3 = vld [vmem:[#allocation3 + $0x10] sm:$0xff]  ;;  %v60_v10 = vstv %s183_s2  ;;  %s148_s27 = smov [#allocation8]  }
  0x1e   :  { %s79_s24 = sld [smem:[#allocation7 + $0x1]]  ;;  %s69_s28 = sshll.u32 %s148_s27, 4  ;;  %s70_s28 = int_to_ptr.vmem [resolvable:$true] %s69_s28 }
  0x1f   :  { %s80_s25 = sld [smem:[#allocation7 + $0x2]]  ;;  %s118_s29 = scalar_lea.vmem %s70_s28, 128 }
  0x20   :  { %p119_p10 = scmp.ne.s32.totalorder %s70_s28, %s118_s29  ;;  %p123_p11 = scmp.lt.s32.totalorder %s70_s28, %s70_s28 }
  0x21   :  { %p124_p12 = scmp.lt.s32.totalorder %s118_s29, %s118_s29 }
  0x23   :  { %v48_v2 = vstv %s43_s23  ;;  %p125_p13 = por %p124_p12, %p123_p11 }
  0x24   :  { %v49_v4 = vmul.f32 %v48_v2, %v47_v0  ;;  %v52_v5 = vstv %s79_s24 }
  0x25   :  { %v53_v6 = vmul.f32 %v52_v5, %v51_v1  ;;  %v57_v7 = vstv %s80_s25  ;;  %p126_p0 = pnand %p125_p13, %p119_p10 }
  0x26   :  { %v58_v8 = vmul.f32 %v57_v7, %v56_v3 }
  0x27   :  { %v54_v9 = vadd.f32 %v53_v6, %v49_v4 }
  0x29   :  { %v59_v11 = vadd.f32 %v58_v8, %v54_v9 }
  0x2b   :  { %v61_v12 = vadd.f32 %v60_v10, %v59_v11 }
  0x2d   :  { %62 = vst [vmem:[#allocation8] sm:$0xff] %v61_v12 }
  0x2e   :  { %129 = shalt.err (!%p126_p0)
}
  0x2f   :  { %72 = dma.vmem_to_hbm [thread:$0]  %s70_s28, 128, %s184_s3, [#allocation5]  }
  0x30   :  { %142 = dma.done.wait [#allocation5], 128  }
  0x31   :  { %143 = vsyncadd [#allocation5], 4294967168 }
  0x32   :  { %76 = vsyncpa [#allocation4], 1 }
  0x33   :  { %77 = vsyncpa [#allocation5], 1 }
  0x34   :  { %78 = vsyncpa [#allocation6], 1 }

</bundles_post_ra>
